<compile_context>
chip_gen: v7x
topology: tpu7x:2x2x1
jax: 0.10.0
libtpu: 0.0.40
codegen_flags: <defaults>
</compile_context>

<pallas_src>
import math

import jax
import jax.numpy as jnp
from jax.experimental import pallas as pl
from jax.experimental.pallas import tpu as pltpu

_LEAKY_SLOPE = 0.01
_OUT_PAD = 128  # lane-dense padded width of the final (128 -> 1) layer


def _mlp_kernel(x_ref,
                w1_ref, b1_ref,
                w2_ref, b2_ref,
                w3_ref, b3_ref,
                w4_ref, b4_ref,
                o_ref):
    """Fused (Linear+folded-BN -> LeakyReLU) x3 -> Linear.  bf16 MXU, f32 accum."""

    def hidden(h_bf16, w_ref, b_ref):
        y = jnp.dot(h_bf16, w_ref[...], preferred_element_type=jnp.float32)
        y = (y + b_ref[...]).astype(jnp.bfloat16)      # folded bias+BN (f32 add), bf16 epilogue
        return jnp.maximum(y, _LEAKY_SLOPE * y)        # LeakyReLU(0.01) in bf16

    h = hidden(x_ref[...].astype(jnp.bfloat16), w1_ref, b1_ref)   # in-kernel f32->bf16 cast
    h = hidden(h, w2_ref, b2_ref)
    h = hidden(h, w3_ref, b3_ref)
    out = jnp.dot(h, w4_ref[...], preferred_element_type=jnp.float32) + b4_ref[...]
    o_ref[...] = out.astype(o_ref.dtype)               # lane-dense (tb, 128) bf16


def _round_up(n, m):
    return ((n + m - 1) // m) * m


def _cdiv(a, b):
    return -(-a // b)


def _choose_tiling(B, batch_tile):
    """Pad batch only to a multiple of 16; split into >=2 even tiles when large."""
    B16 = max(16, _round_up(B, 16))
    num_tiles = _cdiv(B16, batch_tile)
    if num_tiles == 1 and B16 >= 512:
        num_tiles = 2                      # keep both TensorCores busy on v7x
    elif num_tiles > 1 and num_tiles % 2:
        num_tiles += 1                     # even grid -> balanced megacore split
    tb = _round_up(_cdiv(B16, num_tiles), 16)
    return tb, tb * num_tiles, num_tiles


def _resident_spec(arr):
    # constant index_map -> block stays VMEM-resident across batch tiles
    nd = arr.ndim
    return pl.BlockSpec(arr.shape, lambda i, _nd=nd: (0,) * _nd)


def age_predictor_forward(x, folded_params, *, batch_tile=1024):
    """x: (B, input_size) float32 -> (B, 1) float32."""
    B, F_in = x.shape
    tb, B_pad, num_tiles = _choose_tiling(B, batch_tile)
    if B_pad != B:
        x = jnp.pad(x, ((0, B_pad - B), (0, 0)))       # x stays f32 (cast in-kernel)

    w1, b1, w2, b2, w3, b3, w4, b4 = folded_params
    operands = (x, w1, b1, w2, b2, w3, b3, w4, b4)

    out_padded = pl.pallas_call(
        _mlp_kernel,
        out_shape=jax.ShapeDtypeStruct((B_pad, _OUT_PAD), jnp.bfloat16),
        grid_spec=pl.GridSpec(
            grid=(num_tiles,),
            in_specs=[pl.BlockSpec((tb, F_in), lambda i: (i, 0))]
                     + [_resident_spec(a) for a in operands[1:]],
            out_specs=pl.BlockSpec((tb, _OUT_PAD), lambda i: (i, 0)),
        ),
        compiler_params=pltpu.CompilerParams(
            dimension_semantics=("parallel",),          # batch tiles -> 2 TCs on v7x
            vmem_limit_bytes=32 * 1024 * 1024,          # v7x-safe explicit budget
        ),
    )(*operands)

    return out_padded[:B, :1].astype(jnp.float32)


def init_raw_params(key, input_size):
    """PyTorch-equivalent raw params: Kaiming normal (fan_in, leaky_relu a=0.01),
    bias=0.01; BN gamma=1, beta=0, running mean=0, running var=1.
    Weights stored as (fan_in, fan_out) so the kernel computes x @ W."""
    dims = [input_size, 512, 256, 128, 1]
    gain = math.sqrt(2.0 / (1.0 + _LEAKY_SLOPE ** 2))
    keys = jax.random.split(key, 4)
    raw = {}
    for li in range(4):
        fan_in, fan_out = dims[li], dims[li + 1]
        std = gain / math.sqrt(fan_in)
        raw[f"w{li + 1}"] = std * jax.random.normal(keys[li], (fan_in, fan_out),
                                                    dtype=jnp.float32)
        raw[f"b{li + 1}"] = jnp.full((1, fan_out), 0.01, dtype=jnp.float32)
        if li < 3:  # hidden layers have BatchNorm1d
            raw[f"gamma{li + 1}"] = jnp.ones((1, fan_out), jnp.float32)
            raw[f"beta{li + 1}"] = jnp.zeros((1, fan_out), jnp.float32)
            raw[f"mean{li + 1}"] = jnp.zeros((1, fan_out), jnp.float32)
            raw[f"var{li + 1}"] = jnp.ones((1, fan_out), jnp.float32)
    return raw


def fold_params(raw, eps=1e-5):
    """One-time param transform: fold BN into (W, b), cast weights to bf16,
    pad the final N=1 layer to _OUT_PAD lanes."""
    folded = []
    for li in range(1, 4):
        scale = raw[f"gamma{li}"] / jnp.sqrt(raw[f"var{li}"] + eps)     # (1, F_out)
        shift = raw[f"beta{li}"] - raw[f"mean{li}"] * scale
        w_f = (raw[f"w{li}"] * scale).astype(jnp.bfloat16)              # column-wise
        b_f = (raw[f"b{li}"] * scale + shift).astype(jnp.float32)
        folded += [w_f, b_f]
    w4 = raw["w4"]
    b4 = raw["b4"]
    w4p = jnp.zeros((w4.shape[0], _OUT_PAD), jnp.float32).at[:, :1].set(w4)
    b4p = jnp.zeros((1, _OUT_PAD), jnp.float32).at[:, :1].set(b4)
    folded += [w4p.astype(jnp.bfloat16), b4p]
    return tuple(folded)


def _reference_forward(x, raw, eps=1e-5):
    """Pure-JAX f32 eval-mode reference (explicit BN, no fold)."""
    h = x
    for li in range(1, 4):
        y = h @ raw[f"w{li}"] + raw[f"b{li}"]
        y = (y - raw[f"mean{li}"]) / jnp.sqrt(raw[f"var{li}"] + eps)
        y = y * raw[f"gamma{li}"] + raw[f"beta{li}"]
        h = jnp.where(y >= 0.0, y, _LEAKY_SLOPE * y)
    return h @ raw["w4"] + raw["b4"]


if __name__ == "__main__":
    key = jax.random.PRNGKey(0)
    k_x, k_p = jax.random.split(key)

    input_size = 256
    raw = init_raw_params(k_p, input_size)
    folded = fold_params(raw)

    # 1) Small single-tile batch (B=8 -> padded to 16 rows, grid=(1,)).
    x_small = jax.random.normal(k_x, (8, input_size), dtype=jnp.float32)
    out_small = jax.block_until_ready(age_predictor_forward(x_small, folded))
    ref_small = _reference_forward(x_small, raw)
    assert out_small.shape == (8, 1), out_small.shape
    # bf16 matmuls / bf16 output store (f32 accumulation) -> loosened tolerance
    assert jnp.allclose(out_small, ref_small, atol=5e-2, rtol=5e-2), \
        "mismatch vs JAX reference (small batch)"

    # 2) Multi-tile path (grid=(2,)) with a ragged batch (B=40 -> tb=32, B_pad=64).
    x_multi = jax.random.normal(k_x, (40, input_size), dtype=jnp.float32)
    out_multi = jax.block_until_ready(
        age_predictor_forward(x_multi, folded, batch_tile=32))
    ref_multi = _reference_forward(x_multi, raw)
    assert out_multi.shape == (40, 1), out_multi.shape
    assert jnp.allclose(out_multi, ref_multi, atol=5e-2, rtol=5e-2), \
        "mismatch vs JAX reference (multi-tile batch)"

    print("KERNEL_OK")
</pallas_src>

<mosaic_0001>
module attributes {stable_mosaic.version = 11 : i64} {
  func.func @_mlp_kernel(%arg0: i32, %arg1: memref<16x256xf32, #tpu.memory_space<vmem>>, %arg2: memref<256x512xbf16, #tpu.memory_space<vmem>>, %arg3: memref<1x512xf32, #tpu.memory_space<vmem>>, %arg4: memref<512x256xbf16, #tpu.memory_space<vmem>>, %arg5: memref<1x256xf32, #tpu.memory_space<vmem>>, %arg6: memref<256x128xbf16, #tpu.memory_space<vmem>>, %arg7: memref<1x128xf32, #tpu.memory_space<vmem>>, %arg8: memref<128x128xbf16, #tpu.memory_space<vmem>>, %arg9: memref<1x128xf32, #tpu.memory_space<vmem>>, %arg10: memref<16x128xbf16, #tpu.memory_space<vmem>>) attributes {dimension_semantics = [#tpu.dimension_semantics<parallel>], iteration_bounds = array<i64: 1>, scalar_prefetch = 0 : i64, scratch_operands = 0 : i64, tpu.core_type = #tpu.core_type<tc>, window_params = [{transform_indices = @transform_0, window_bounds = array<i64: 16, 256>}, {pipeline_mode = #tpu.pipeline_mode<synchronous>, transform_indices = @transform_1, window_bounds = array<i64: 256, 512>}, {pipeline_mode = #tpu.pipeline_mode<synchronous>, transform_indices = @transform_2, window_bounds = array<i64: 1, 512>}, {pipeline_mode = #tpu.pipeline_mode<synchronous>, transform_indices = @transform_3, window_bounds = array<i64: 512, 256>}, {pipeline_mode = #tpu.pipeline_mode<synchronous>, transform_indices = @transform_4, window_bounds = array<i64: 1, 256>}, {pipeline_mode = #tpu.pipeline_mode<synchronous>, transform_indices = @transform_5, window_bounds = array<i64: 256, 128>}, {pipeline_mode = #tpu.pipeline_mode<synchronous>, transform_indices = @transform_6, window_bounds = array<i64: 1, 128>}, {pipeline_mode = #tpu.pipeline_mode<synchronous>, transform_indices = @transform_7, window_bounds = array<i64: 128, 128>}, {pipeline_mode = #tpu.pipeline_mode<synchronous>, transform_indices = @transform_8, window_bounds = array<i64: 1, 128>}, {transform_indices = @transform_9, window_bounds = array<i64: 16, 128>}]} {
    %c0 = arith.constant 0 : index
    %c0_0 = arith.constant 0 : index
    %0 = vector.load %arg1[%c0, %c0_0] : memref<16x256xf32, #tpu.memory_space<vmem>>, vector<16x256xf32>
    %1 = arith.truncf %0 : vector<16x256xf32> to vector<16x256xbf16>
    %c0_1 = arith.constant 0 : index
    %c0_2 = arith.constant 0 : index
    %2 = vector.load %arg2[%c0_1, %c0_2] : memref<256x512xbf16, #tpu.memory_space<vmem>>, vector<256x512xbf16>
    %cst = arith.constant dense<0.000000e+00> : vector<16x512xf32>
    %3 = tpu.matmul %1, %2, %cst {dimension_numbers = #tpu.dot_dimension_numbers<[1], [0], [0], [1], [0, 0, 1, 1], [], []>} : vector<16x256xbf16>, vector<256x512xbf16>, vector<16x512xf32> -> vector<16x512xf32>
    %c0_3 = arith.constant 0 : index
    %c0_4 = arith.constant 0 : index
    %4 = vector.load %arg3[%c0_3, %c0_4] : memref<1x512xf32, #tpu.memory_space<vmem>>, vector<1x512xf32>
    %5 = vector.broadcast %4 : vector<1x512xf32> to vector<16x512xf32>
    %6 = arith.addf %3, %5 : vector<16x512xf32>
    %7 = arith.truncf %6 : vector<16x512xf32> to vector<16x512xbf16>
    %cst_5 = arith.constant 1.000980e-02 : bf16
    %8 = vector.broadcast %cst_5 : bf16 to vector<16x512xbf16>
    %9 = arith.mulf %8, %7 : vector<16x512xbf16>
    %10 = arith.maximumf %7, %9 : vector<16x512xbf16>
    %c0_6 = arith.constant 0 : index
    %c0_7 = arith.constant 0 : index
    %11 = vector.load %arg4[%c0_6, %c0_7] : memref<512x256xbf16, #tpu.memory_space<vmem>>, vector<512x256xbf16>
    %cst_8 = arith.constant dense<0.000000e+00> : vector<16x256xf32>
    %12 = tpu.matmul %10, %11, %cst_8 {dimension_numbers = #tpu.dot_dimension_numbers<[1], [0], [0], [1], [0, 0, 1, 1], [], []>} : vector<16x512xbf16>, vector<512x256xbf16>, vector<16x256xf32> -> vector<16x256xf32>
    %c0_9 = arith.constant 0 : index
    %c0_10 = arith.constant 0 : index
    %13 = vector.load %arg5[%c0_9, %c0_10] : memref<1x256xf32, #tpu.memory_space<vmem>>, vector<1x256xf32>
    %14 = vector.broadcast %13 : vector<1x256xf32> to vector<16x256xf32>
    %15 = arith.addf %12, %14 : vector<16x256xf32>
    %16 = arith.truncf %15 : vector<16x256xf32> to vector<16x256xbf16>
    %cst_11 = arith.constant 1.000980e-02 : bf16
    %17 = vector.broadcast %cst_11 : bf16 to vector<16x256xbf16>
    %18 = arith.mulf %17, %16 : vector<16x256xbf16>
    %19 = arith.maximumf %16, %18 : vector<16x256xbf16>
    %c0_12 = arith.constant 0 : index
    %c0_13 = arith.constant 0 : index
    %20 = vector.load %arg6[%c0_12, %c0_13] : memref<256x128xbf16, #tpu.memory_space<vmem>>, vector<256x128xbf16>
    %cst_14 = arith.constant dense<0.000000e+00> : vector<16x128xf32>
    %21 = tpu.matmul %19, %20, %cst_14 {dimension_numbers = #tpu.dot_dimension_numbers<[1], [0], [0], [1], [0, 0, 1, 1], [], []>} : vector<16x256xbf16>, vector<256x128xbf16>, vector<16x128xf32> -> vector<16x128xf32>
    %c0_15 = arith.constant 0 : index
    %c0_16 = arith.constant 0 : index
    %22 = vector.load %arg7[%c0_15, %c0_16] : memref<1x128xf32, #tpu.memory_space<vmem>>, vector<1x128xf32>
    %23 = vector.broadcast %22 : vector<1x128xf32> to vector<16x128xf32>
    %24 = arith.addf %21, %23 : vector<16x128xf32>
    %25 = arith.truncf %24 : vector<16x128xf32> to vector<16x128xbf16>
    %cst_17 = arith.constant 1.000980e-02 : bf16
    %26 = vector.broadcast %cst_17 : bf16 to vector<16x128xbf16>
    %27 = arith.mulf %26, %25 : vector<16x128xbf16>
    %28 = arith.maximumf %25, %27 : vector<16x128xbf16>
    %c0_18 = arith.constant 0 : index
    %c0_19 = arith.constant 0 : index
    %29 = vector.load %arg8[%c0_18, %c0_19] : memref<128x128xbf16, #tpu.memory_space<vmem>>, vector<128x128xbf16>
    %cst_20 = arith.constant dense<0.000000e+00> : vector<16x128xf32>
    %30 = tpu.matmul %28, %29, %cst_20 {dimension_numbers = #tpu.dot_dimension_numbers<[1], [0], [0], [1], [0, 0, 1, 1], [], []>} : vector<16x128xbf16>, vector<128x128xbf16>, vector<16x128xf32> -> vector<16x128xf32>
    %c0_21 = arith.constant 0 : index
    %c0_22 = arith.constant 0 : index
    %31 = vector.load %arg9[%c0_21, %c0_22] : memref<1x128xf32, #tpu.memory_space<vmem>>, vector<1x128xf32>
    %32 = vector.broadcast %31 : vector<1x128xf32> to vector<16x128xf32>
    %33 = arith.addf %30, %32 : vector<16x128xf32>
    %34 = arith.truncf %33 : vector<16x128xf32> to vector<16x128xbf16>
    %c0_23 = arith.constant 0 : index
    %c0_24 = arith.constant 0 : index
    %35 = vector.load %arg10[%c0_23, %c0_24] : memref<16x128xbf16, #tpu.memory_space<vmem>>, vector<16x128xbf16>
    tpu.vector_store %arg10[%c0_23, %c0_24], %34 {strides = array<i32>} : memref<16x128xbf16, #tpu.memory_space<vmem>>, vector<16x128xbf16>,
    return
  }
  func.func @transform_0(%arg0: i32) -> (i32, i32) {
    %c0_i32 = arith.constant 0 : i32
    %c0_i32_0 = arith.constant 0 : i32
    return %arg0, %c0_i32 : i32, i32
  }
  func.func @transform_1(%arg0: i32) -> (i32, i32) {
    %c0_i32 = arith.constant 0 : i32
    %c0_i32_0 = arith.constant 0 : i32
    %c0_i32_1 = arith.constant 0 : i32
    return %c0_i32, %c0_i32_0 : i32, i32
  }
  func.func @transform_2(%arg0: i32) -> (i32, i32) {
    %c0_i32 = arith.constant 0 : i32
    %c0_i32_0 = arith.constant 0 : i32
    %c0_i32_1 = arith.constant 0 : i32
    return %c0_i32, %c0_i32_0 : i32, i32
  }
  func.func @transform_3(%arg0: i32) -> (i32, i32) {
    %c0_i32 = arith.constant 0 : i32
    %c0_i32_0 = arith.constant 0 : i32
    %c0_i32_1 = arith.constant 0 : i32
    return %c0_i32, %c0_i32_0 : i32, i32
  }
  func.func @transform_4(%arg0: i32) -> (i32, i32) {
    %c0_i32 = arith.constant 0 : i32
    %c0_i32_0 = arith.constant 0 : i32
    %c0_i32_1 = arith.constant 0 : i32
    return %c0_i32, %c0_i32_0 : i32, i32
  }
  func.func @transform_5(%arg0: i32) -> (i32, i32) {
    %c0_i32 = arith.constant 0 : i32
    %c0_i32_0 = arith.constant 0 : i32
    %c0_i32_1 = arith.constant 0 : i32
    return %c0_i32, %c0_i32_0 : i32, i32
  }
  func.func @transform_6(%arg0: i32) -> (i32, i32) {
    %c0_i32 = arith.constant 0 : i32
    %c0_i32_0 = arith.constant 0 : i32
    %c0_i32_1 = arith.constant 0 : i32
    return %c0_i32, %c0_i32_0 : i32, i32
  }
  func.func @transform_7(%arg0: i32) -> (i32, i32) {
    %c0_i32 = arith.constant 0 : i32
    %c0_i32_0 = arith.constant 0 : i32
    %c0_i32_1 = arith.constant 0 : i32
    return %c0_i32, %c0_i32_0 : i32, i32
  }
  func.func @transform_8(%arg0: i32) -> (i32, i32) {
    %c0_i32 = arith.constant 0 : i32
    %c0_i32_0 = arith.constant 0 : i32
    %c0_i32_1 = arith.constant 0 : i32
    return %c0_i32, %c0_i32_0 : i32, i32
  }
  func.func @transform_9(%arg0: i32) -> (i32, i32) {
    %c0_i32 = arith.constant 0 : i32
    %c0_i32_0 = arith.constant 0 : i32
    return %arg0, %c0_i32 : i32, i32
  }
}

</mosaic_0001>

<bundles_post_ra>
// kernel: tpu_custom_call.1
= control target key start
LH: loop header
LB: loop body
LE: loop exit
PB: predicated region body
PF: predicated region fallthrough
CT: control target
= control target key end

     0   :  { %14 = vsyncpa [#allocation3], 0  ;;  %s2204_s0 = inlined_call_operand.hbm [shape: f32[16,256], index: 0, kind: input, shape index: {}]   ;;  %s2205_s1 = inlined_call_operand.hbm [shape: bf16[256,512], index: 1, kind: input, shape index: {}]   ;;  %s2206_s2 = inlined_call_operand.vmem [shape: f32[1,512], index: 2, kind: input, shape index: {}]   ;;  %s2207_s3 = inlined_call_operand.hbm [shape: bf16[512,256], index: 3, kind: input, shape index: {}]   ;;  %s2208_s4 = inlined_call_operand.vmem [shape: f32[1,256], index: 4, kind: input, shape index: {}]   ;;  %s2209_s5 = inlined_call_operand.hbm [shape: bf16[256,128], index: 5, kind: input, shape index: {}]   ;;  %s2210_s6 = inlined_call_operand.vmem [shape: f32[1,128], index: 6, kind: input, shape index: {}]   ;;  %s2211_s7 = inlined_call_operand.hbm [shape: bf16[128,128], index: 7, kind: input, shape index: {}]   ;;  %s2212_s8 = inlined_call_operand.vmem [shape: f32[1,128], index: 8, kind: input, shape index: {}]   ;;  %s2213_s9 = inlined_call_operand.hbm [shape: bf16[16,128], index: 9, kind: output, shape index: {}]  }
   0x1   :  { %15 = vsyncpa [#allocation6], 0 }
   0x2   :  { %16 = vsyncpa [#allocation9], 0 }
   0x3   :  { %17 = vsyncpa [#allocation4], 0  ;;  %s2013_s30 = smov [#allocation5]   ;;  %s2014_s11 = smov [#allocation8]  }
   0x4   :  { %s35_s10 = sshll.u32 %s2013_s30, 4  ;;  %s63_s12 = sshll.u32 %s2014_s11, 4  ;;  %s36_s10 = int_to_ptr.vmem [resolvable:$true] %s35_s10  ;;  %s2077_s12 = int_to_ptr.vmem [resolvable:$true] %s63_s12 }
   0x5   :  { %s1873_s15 = scalar_lea.hbm %s2205_s1, 8192 }
   0x6   :  { %p1874_p0 = scmp.ne.s32.totalorder %s2205_s1, %s1873_s15  ;;  %p1877_p1 = scmp.lt.u32.totalorder %s1873_s15, %s2205_s1 }
   0x8   :  { %p1879_p2 = pnand %p1877_p1, %p1874_p0 }
   0xa   :  { %1882 = shalt.err (!%p1879_p2)
}
   0xb   :  { %s1883_s20 = scalar_lea.vmem %s36_s10, 8192  ;;  %p1888_p4 = scmp.lt.s32.totalorder %s36_s10, %s36_s10 }
   0xc   :  { %p1884_p3 = scmp.ne.s32.totalorder %s36_s10, %s1883_s20  ;;  %p1889_p5 = scmp.lt.s32.totalorder %s1883_s20, %s1883_s20 }
   0xe   :  { %p1890_p6 = por %p1889_p5, %p1888_p4 }
  0x10   :  { %p1891_p7 = pnand %p1890_p6, %p1884_p3 }
  0x12   :  { %1894 = shalt.err (!%p1891_p7)
}
  0x13   :  { %s2015_s21 = smov 256   ;;  %s2016_s22 = smov 16  }
  0x14   :  { %41 = dma.hbm_to_vmem [thread:$0]  %s2205_s1, 8192, %s36_s10, [#allocation6], %s2015_s21, %s2015_s21, %s2016_s22  }
  0x15   :  { %s1895_s27 = scalar_lea.hbm %s2209_s5, 2048 }
  0x16   :  { %p1896_p8 = scmp.ne.s32.totalorder %s2209_s5, %s1895_s27  ;;  %p1899_p9 = scmp.lt.u32.totalorder %s1895_s27, %s2209_s5 }
  0x18   :  { %p1901_p10 = pnand %p1899_p9, %p1896_p8 }
  0x1a   :  { %1904 = shalt.err (!%p1901_p10)
}
  0x1b   :  { %s1905_s13 = scalar_lea.vmem %s2077_s12, 2048  ;;  %p1910_p12 = scmp.lt.s32.totalorder %s2077_s12, %s2077_s12 }
  0x1c   :  { %p1906_p11 = scmp.ne.s32.totalorder %s2077_s12, %s1905_s13  ;;  %p1911_p13 = scmp.lt.s32.totalorder %s1905_s13, %s1905_s13 }
  0x1e   :  { %p1912_p0 = por %p1911_p13, %p1910_p12 }
  0x20   :  { %p1913_p1 = pnand %p1912_p0, %p1906_p11 }
  0x22   :  { %1916 = shalt.err (!%p1913_p1)
}
  0x23   :  { %s2017_s1 = smov 64   ;;  %s2018_s10 = smov 4  }
  0x24   :  { %69 = dma.hbm_to_vmem [thread:$0]  %s2209_s5, 2048, %s2077_s12, [#allocation9], %s2017_s1, %s2017_s1, %s2018_s10  }
  0x25   :  { %s2019_s16 = smov [#allocation2]   ;;  %s2020_s18 = smov [#allocation7]  }
  0x26   :  { %s23_s17 = sshll.u32 %s2019_s16, 4  ;;  %s49_s19 = sshll.u32 %s2020_s18, 4  ;;  %s24_s17 = int_to_ptr.vmem [resolvable:$true] %s23_s17  ;;  %s2114_s19 = int_to_ptr.vmem [resolvable:$true] %s49_s19 }
  0x27   :  { %s1917_s24 = scalar_lea.hbm %s2204_s0, 512 }
  0x28   :  { %p1918_p2 = scmp.ne.s32.totalorder %s2204_s0, %s1917_s24  ;;  %p1921_p3 = scmp.lt.u32.totalorder %s1917_s24, %s2204_s0 }
  0x2a   :  { %p1923_p4 = pnand %p1921_p3, %p1918_p2 }
  0x2c   :  { %1926 = shalt.err (!%p1923_p4)
}
  0x2d   :  { %s1927_s5 = scalar_lea.vmem %s24_s17, 512  ;;  %p1932_p6 = scmp.lt.s32.totalorder %s24_s17, %s24_s17 }
  0x2e   :  { %p1928_p5 = scmp.ne.s32.totalorder %s24_s17, %s1927_s5  ;;  %p1933_p7 = scmp.lt.s32.totalorder %s1927_s5, %s1927_s5 }
  0x30   :  { %p1934_p8 = por %p1933_p7, %p1932_p6 }
  0x32   :  { %p1935_p9 = pnand %p1934_p8, %p1928_p5 }
  0x34   :  { %1938 = shalt.err (!%p1935_p9)
}
  0x35   :  { %29 = dma.hbm_to_vmem [thread:$0]  %s2204_s0, 512, %s24_s17, [#allocation3], %s2015_s21, %s2015_s21, %s2016_s22  }
  0x36   :  { %s1939_s13 = scalar_lea.hbm %s2207_s3, 8192 }
  0x37   :  { %p1940_p10 = scmp.ne.s32.totalorder %s2207_s3, %s1939_s13  ;;  %p1943_p11 = scmp.lt.u32.totalorder %s1939_s13, %s2207_s3 }
  0x39   :  { %p1945_p12 = pnand %p1943_p11, %p1940_p10 }
  0x3b   :  { %1948 = shalt.err (!%p1945_p12)
}
  0x3c   :  { %s1949_s20 = scalar_lea.vmem %s2114_s19, 8192  ;;  %p1954_p0 = scmp.lt.s32.totalorder %s2114_s19, %s2114_s19 }
  0x3d   :  { %p1950_p13 = scmp.ne.s32.totalorder %s2114_s19, %s1949_s20  ;;  %p1955_p1 = scmp.lt.s32.totalorder %s1949_s20, %s1949_s20 }
  0x3f   :  { %p1956_p2 = por %p1955_p1, %p1954_p0 }
  0x41   :  { %p1957_p3 = pnand %p1956_p2, %p1950_p13 }
  0x43   :  { %1960 = shalt.err (!%p1957_p3)
}
  0x44   :  { %s2021_s0 = smov 128   ;;  %s2022_s21 = smov 8  }
  0x45   :  { %55 = dma.hbm_to_vmem [thread:$0]  %s2207_s3, 8192, %s2114_s19, [#allocation6], %s2021_s0, %s2021_s0, %s2022_s21  }
  0x46   :  { %s2023_s23 = smov [#allocation10]   ;;  %s1961_s27 = scalar_lea.hbm %s2211_s7, 1024 }
  0x47   :  { %s77_s24 = sshll.u32 %s2023_s23, 4  ;;  %p1962_p4 = scmp.ne.s32.totalorder %s2211_s7, %s1961_s27  ;;  %s78_s24 = int_to_ptr.vmem [resolvable:$true] %s77_s24 }
  0x48   :  { %p1965_p5 = scmp.lt.u32.totalorder %s1961_s27, %s2211_s7 }
  0x4a   :  { %p1967_p6 = pnand %p1965_p5, %p1962_p4 }
  0x4c   :  { %1970 = shalt.err (!%p1967_p6)
}
  0x4d   :  { %s1971_s30 = scalar_lea.vmem %s78_s24, 1024  ;;  %p1976_p8 = scmp.lt.s32.totalorder %s78_s24, %s78_s24 }
  0x4e   :  { %p1972_p7 = scmp.ne.s32.totalorder %s78_s24, %s1971_s30  ;;  %p1977_p9 = scmp.lt.s32.totalorder %s1971_s30, %s1971_s30 }
  0x50   :  { %p1978_p10 = por %p1977_p9, %p1976_p8 }
  0x52   :  { %p1979_p11 = pnand %p1978_p10, %p1972_p7 }
  0x54   :  { %1982 = shalt.err (!%p1979_p11)
}
  0x55   :  { %83 = dma.hbm_to_vmem [thread:$0]  %s2211_s7, 1024, %s78_s24, [#allocation9], %s2017_s1, %s2017_s1, %s2018_s10  }
  0x56   :  { %2005 = dma.done.wait [#allocation3], 512  }
  0x57   :  { %2006 = vsyncadd [#allocation3], 4294966784 }
  0x58   :  { %2007 = dma.done.wait [#allocation6], 16384  }
  0x59   :  { %2008 = vsyncadd [#allocation6], 4294950912 }
  0x5a   :  { %2009 = dma.done.wait [#allocation9], 3072  }
  0x5b   :  { %2010 = vsyncadd [#allocation9], 4294964224  ;;  %v1657_v0 = vld [vmem:[#allocation5 + $0x4] ss:$16 sps:$4 sm:$0xff]   ;;  %v1659_v1 = vld [vmem:[#allocation5] ss:$16 sps:$4 sm:$0xff]  }
  0x5c   :  { %515 = vmatprep.subr.bf16.mxu0 %v1657_v0  ;;  %v1660_v2 = vld [vmem:[#allocation5 + $0x24] ss:$16 sps:$4 sm:$0xff]   ;;  %v1662_v3 = vld [vmem:[#allocation5 + $0x20] ss:$16 sps:$4 sm:$0xff]   ;;  %v1702_v13 = vld [vmem:[#allocation5 + $0xc] ss:$16 sps:$4 sm:$0xff]  }
  0x5d   :  { %516 = vmatpush1.bf16.msra.mxu0 %v1659_v1  ;;  %v1663_v4 = vld [vmem:[#allocation5 + $0x44] ss:$16 sps:$4 sm:$0xff]   ;;  %v1665_v5 = vld [vmem:[#allocation5 + $0x40] ss:$16 sps:$4 sm:$0xff]   ;;  %v1704_v14 = vld [vmem:[#allocation5 + $0x8] ss:$16 sps:$4 sm:$0xff]   ;;  %558 = vmatprep.subr.bf16.mxu1 %v1702_v13 }
  0x5e   :  { %517 = vmatprep.subr.bf16.mxu0 %v1660_v2  ;;  %v1666_v6 = vld [vmem:[#allocation5 + $0x64] ss:$16 sps:$4 sm:$0xff]   ;;  %v1668_v7 = vld [vmem:[#allocation5 + $0x60] ss:$16 sps:$4 sm:$0xff]   ;;  %559 = vmatpush1.bf16.msra.mxu1 %v1704_v14  ;;  %v1708_v16 = vld [vmem:[#allocation5 + $0x2c] ss:$16 sps:$4 sm:$0xff]  }
  0x5f   :  { %v1669_v8 = vld [vmem:[#allocation5 + $0x84] ss:$16 sps:$4 sm:$0xff]   ;;  %v1671_v9 = vld [vmem:[#allocation5 + $0x80] ss:$16 sps:$4 sm:$0xff]   ;;  %v104_v17 = vld [vmem:[#allocation2 + $0x8] sm:$0xff]  ;;  %560 = vmatprep.subr.bf16.mxu1 %v1708_v16  ;;  %vm2025_vm0 = vmmov 0  }
  0x60   :  { %v1672_v10 = vld [vmem:[#allocation5 + $0xa4] ss:$16 sps:$4 sm:$0xff]   ;;  %v1674_v11 = vld [vmem:[#allocation5 + $0xa0] ss:$16 sps:$4 sm:$0xff]   ;;  %v106_v19 = vld [vmem:[#allocation2 + $0x18] sm:$0xff]  ;;  %s2026_s18 = smov [#allocation11]  }
  0x61   :  { %518 = vmatpush1.bf16.msra.mxu0 %v1662_v3  ;;  %v1675_v12 = vld [vmem:[#allocation5 + $0xc4] ss:$16 sps:$4 sm:$0xff]   ;;  %v1677_v15 = vld [vmem:[#allocation5 + $0xc0] ss:$16 sps:$4 sm:$0xff]   ;;  %v1710_v20 = vld [vmem:[#allocation5 + $0x28] ss:$16 sps:$4 sm:$0xff]   ;;  %v108_v21 = vpack.c.bf16 %v106_v19, %v104_v17 }
  0x62   :  { %519 = vmatprep.subr.bf16.mxu0 %v1663_v4  ;;  %v1678_v18 = vld [vmem:[#allocation5 + $0xe4] ss:$16 sps:$4 sm:$0xff]   ;;  %v1711_v22 = vld [vmem:[#allocation5 + $0x4c] ss:$16 sps:$4 sm:$0xff]   ;;  %v1680_v23 = vld [vmem:[#allocation5 + $0xe0] ss:$16 sps:$4 sm:$0xff]   ;;  %561 = vmatpush1.bf16.msra.mxu1 %v1710_v20 }
  0x63   :  { %v1681_v24 = vld [vmem:[#allocation5 + $0x104] ss:$16 sps:$4 sm:$0xff]   ;;  %547 = vmatprep.mubr.bf16.mxu0 %v108_v21  ;;  %v1713_v25 = vld [vmem:[#allocation5 + $0x48] ss:$16 sps:$4 sm:$0xff]   ;;  %562 = vmatprep.subr.bf16.mxu1 %v1711_v22  ;;  %v1714_v26 = vld [vmem:[#allocation5 + $0x6c] ss:$16 sps:$4 sm:$0xff]  }
  0x64   :  { %590 = vmatprep.mubr.bf16.mxu1 %v108_v21  ;;  %v1683_v27 = vld [vmem:[#allocation5 + $0x100] ss:$16 sps:$4 sm:$0xff]   ;;  %v1684_v28 = vld [vmem:[#allocation5 + $0x124] ss:$16 sps:$4 sm:$0xff]   ;;  %v1716_v29 = vld [vmem:[#allocation5 + $0x68] ss:$16 sps:$4 sm:$0xff]  }
  0x65   :  { %520 = vmatpush1.bf16.msra.mxu0 %v1665_v5  ;;  %v1717_v30 = vld [vmem:[#allocation5 + $0x8c] ss:$16 sps:$4 sm:$0xff]   ;;  %v1686_v31 = vld [vmem:[#allocation5 + $0x120] ss:$16 sps:$4 sm:$0xff]   ;;  %v1687_v32 = vld [vmem:[#allocation5 + $0x144] ss:$16 sps:$4 sm:$0xff]  }
  0x66   :  { %521 = vmatprep.subr.bf16.mxu0 %v1666_v6  ;;  %563 = vmatpush1.bf16.msra.mxu1 %v1713_v25  ;;  %v1719_v33 = vld [vmem:[#allocation5 + $0x88] ss:$16 sps:$4 sm:$0xff]   ;;  %v1720_v34 = vld [vmem:[#allocation5 + $0xac] ss:$16 sps:$4 sm:$0xff]   ;;  %v1689_v35 = vld [vmem:[#allocation5 + $0x140] ss:$16 sps:$4 sm:$0xff]  }
  0x67   :  { %564 = vmatprep.subr.bf16.mxu1 %v1714_v26  ;;  %v1690_v36 = vld [vmem:[#allocation5 + $0x164] ss:$16 sps:$4 sm:$0xff]   ;;  %v1722_v37 = vld [vmem:[#allocation5 + $0xa8] ss:$16 sps:$4 sm:$0xff]   ;;  %v1723_v38 = vld [vmem:[#allocation5 + $0xcc] ss:$16 sps:$4 sm:$0xff]  }
  0x68   :  { %v1692_v39 = vld [vmem:[#allocation5 + $0x160] ss:$16 sps:$4 sm:$0xff]   ;;  %v1693_v40 = vld [vmem:[#allocation5 + $0x184] ss:$16 sps:$4 sm:$0xff]   ;;  %v1725_v41 = vld [vmem:[#allocation5 + $0xc8] ss:$16 sps:$4 sm:$0xff]  }
  0x69   :  { %522 = vmatpush1.bf16.msra.mxu0 %v1668_v7  ;;  %v1726_v42 = vld [vmem:[#allocation5 + $0xec] ss:$16 sps:$4 sm:$0xff]   ;;  %v1695_v43 = vld [vmem:[#allocation5 + $0x180] ss:$16 sps:$4 sm:$0xff]   ;;  %v1696_v44 = vld [vmem:[#allocation5 + $0x1a4] ss:$16 sps:$4 sm:$0xff]  }
  0x6a   :  { %523 = vmatprep.subr.bf16.mxu0 %v1669_v8  ;;  %565 = vmatpush1.bf16.msra.mxu1 %v1716_v29  ;;  %v1728_v45 = vld [vmem:[#allocation5 + $0xe8] ss:$16 sps:$4 sm:$0xff]   ;;  %v1729_v46 = vld [vmem:[#allocation5 + $0x10c] ss:$16 sps:$4 sm:$0xff]   ;;  %v1698_v47 = vld [vmem:[#allocation5 + $0x1a0] ss:$16 sps:$4 sm:$0xff]  }
  0x6b   :  { %566 = vmatprep.subr.bf16.mxu1 %v1717_v30  ;;  %v1699_v48 = vld [vmem:[#allocation5 + $0x1c4] ss:$16 sps:$4 sm:$0xff]   ;;  %v1731_v49 = vld [vmem:[#allocation5 + $0x108] ss:$16 sps:$4 sm:$0xff]   ;;  %v1732_v50 = vld [vmem:[#allocation5 + $0x12c] ss:$16 sps:$4 sm:$0xff]  }
  0x6c   :  { %v1701_v51 = vld [vmem:[#allocation5 + $0x1c0] ss:$16 sps:$4 sm:$0xff]   ;;  %v1705_v52 = vld [vmem:[#allocation5 + $0x1e4] ss:$16 sps:$4 sm:$0xff]   ;;  %v1734_v53 = vld [vmem:[#allocation5 + $0x128] ss:$16 sps:$4 sm:$0xff]  }
  0x6d   :  { %524 = vmatpush1.bf16.msra.mxu0 %v1671_v9  ;;  %v1735_v54 = vld [vmem:[#allocation5 + $0x14c] ss:$16 sps:$4 sm:$0xff]   ;;  %v1707_v55 = vld [vmem:[#allocation5 + $0x1e0] ss:$16 sps:$4 sm:$0xff]   ;;  %v1737_v58 = vld [vmem:[#allocation5 + $0x148] ss:$16 sps:$4 sm:$0xff]  }
  0x6e   :  { %525 = vmatprep.subr.bf16.mxu0 %v1672_v10  ;;  %567 = vmatpush1.bf16.msra.mxu1 %v1719_v33  ;;  %v103_v56 = vld [vmem:[#allocation2] sm:$0xff]  ;;  %v105_v57 = vld [vmem:[#allocation2 + $0x10] sm:$0xff]  ;;  %v1738_v60 = vld [vmem:[#allocation5 + $0x16c] ss:$16 sps:$4 sm:$0xff]   ;;  %s1407_s20 = sshll.u32 %s2026_s18, 4  ;;  %s1408_s20 = int_to_ptr.vmem [resolvable:$true] %s1407_s20 }
  0x6f   :  { %568 = vmatprep.subr.bf16.mxu1 %v1720_v34  ;;  %v1755_v59 = vld [vmem:[#allocation7 + $0x4] ss:$8 sps:$4 sm:$0xff]   ;;  %v1753_v61 = vld [vmem:[#allocation7] ss:$8 sps:$4 sm:$0xff]   ;;  %v107_v62 = vpack.c.bf16 %v105_v57, %v103_v56  ;;  %v1758_v0 = vld [vmem:[#allocation7 + $0x14] ss:$8 sps:$4 sm:$0xff]   ;;  %p1988_p13 = scmp.lt.s32.totalorder %s1408_s20, %s1408_s20 }
  0x70   :  { %v1740_v63 = vld [vmem:[#allocation5 + $0x168] ss:$16 sps:$4 sm:$0xff]   ;;  %v1741_v1 = vld [vmem:[#allocation5 + $0x18c] ss:$16 sps:$4 sm:$0xff]  }
  0x71   :  { %526 = vmatpush1.bf16.msra.mxu0 %v1674_v11  ;;  %v1756_v2 = vld [vmem:[#allocation7 + $0x10] ss:$8 sps:$4 sm:$0xff]   ;;  %v1761_v4 = vld [vmem:[#allocation7 + $0x24] ss:$8 sps:$4 sm:$0xff]   ;;  %v1759_v6 = vld [vmem:[#allocation7 + $0x20] ss:$8 sps:$4 sm:$0xff]  }
  0x72   :  { %527 = vmatprep.subr.bf16.mxu0 %v1675_v12  ;;  %569 = vmatpush1.bf16.msra.mxu1 %v1722_v37  ;;  %v1743_v3 = vld [vmem:[#allocation5 + $0x188] ss:$16 sps:$4 sm:$0xff]   ;;  %v1744_v5 = vld [vmem:[#allocation5 + $0x1ac] ss:$16 sps:$4 sm:$0xff]  }
  0x73   :  { %570 = vmatprep.subr.bf16.mxu1 %v1723_v38  ;;  %v1746_v7 = vld [vmem:[#allocation5 + $0x1a8] ss:$16 sps:$4 sm:$0xff]   ;;  %v1764_v8 = vld [vmem:[#allocation7 + $0x34] ss:$8 sps:$4 sm:$0xff]   ;;  %v1767_v12 = vld [vmem:[#allocation7 + $0x44] ss:$8 sps:$4 sm:$0xff]  }
  0x74   :  { %v1747_v9 = vld [vmem:[#allocation5 + $0x1cc] ss:$16 sps:$4 sm:$0xff]   ;;  %v1762_v10 = vld [vmem:[#allocation7 + $0x30] ss:$8 sps:$4 sm:$0xff]   ;;  %v1765_v14 = vld [vmem:[#allocation7 + $0x40] ss:$8 sps:$4 sm:$0xff]  }
  0x75   :  { %528 = vmatpush1.bf16.msra.mxu0 %v1677_v15  ;;  %v1749_v11 = vld [vmem:[#allocation5 + $0x1c8] ss:$16 sps:$4 sm:$0xff]   ;;  %v1750_v13 = vld [vmem:[#allocation5 + $0x1ec] ss:$16 sps:$4 sm:$0xff]  }
  0x76   :  { %529 = vmatprep.subr.bf16.mxu0 %v1678_v18  ;;  %571 = vmatpush1.bf16.msra.mxu1 %v1725_v41  ;;  %v1752_v15 = vld [vmem:[#allocation5 + $0x1e8] ss:$16 sps:$4 sm:$0xff]   ;;  %v1770_v16 = vld [vmem:[#allocation7 + $0x54] ss:$8 sps:$4 sm:$0xff]   ;;  %v1773_v18 = vld [vmem:[#allocation7 + $0x64] ss:$8 sps:$4 sm:$0xff]  }
  0x77   :  { %572 = vmatprep.subr.bf16.mxu1 %v1726_v42  ;;  %v1768_v17 = vld [vmem:[#allocation7 + $0x50] ss:$8 sps:$4 sm:$0xff]   ;;  %v1771_v19 = vld [vmem:[#allocation7 + $0x60] ss:$8 sps:$4 sm:$0xff]   ;;  %v1776_v20 = vld [vmem:[#allocation7 + $0x74] ss:$8 sps:$4 sm:$0xff]  }
  0x78   :  { %v1774_v21 = vld [vmem:[#allocation7 + $0x70] ss:$8 sps:$4 sm:$0xff]   ;;  %v1779_v22 = vld [vmem:[#allocation7 + $0x84] ss:$8 sps:$4 sm:$0xff]  }
  0x79   :  { %530 = vmatpush1.bf16.msra.mxu0 %v1680_v23  ;;  %v1777_v23 = vld [vmem:[#allocation7 + $0x80] ss:$8 sps:$4 sm:$0xff]   ;;  %v1780_v25 = vld [vmem:[#allocation7 + $0x90] ss:$8 sps:$4 sm:$0xff]   ;;  %v1785_v26 = vld [vmem:[#allocation7 + $0xa4] ss:$8 sps:$4 sm:$0xff]  }
  0x7a   :  { %531 = vmatprep.subr.bf16.mxu0 %v1681_v24  ;;  %573 = vmatpush1.bf16.msra.mxu1 %v1728_v45  ;;  %v1782_v24 = vld [vmem:[#allocation7 + $0x94] ss:$8 sps:$4 sm:$0xff]   ;;  %v1786_v29 = vld [vmem:[#allocation7 + $0xb0] ss:$8 sps:$4 sm:$0xff]   ;;  %v1791_v30 = vld [vmem:[#allocation7 + $0xc4] ss:$8 sps:$4 sm:$0xff]  }
  0x7b   :  { %574 = vmatprep.subr.bf16.mxu1 %v1729_v46  ;;  %v1792_v33 = vld [vmem:[#allocation7 + $0xd0] ss:$8 sps:$4 sm:$0xff]   ;;  %v1797_v34 = vld [vmem:[#allocation7 + $0xe4] ss:$8 sps:$4 sm:$0xff]  }
  0x7c   :  { %v1798_v37 = vld [vmem:[#allocation7 + $0xf0] ss:$8 sps:$4 sm:$0xff]   ;;  %v1803_v38 = vld [vmem:[#allocation7 + $0x104] ss:$8 sps:$4 sm:$0xff]  }
  0x7d   :  { %532 = vmatpush1.bf16.msra.mxu0 %v1683_v27  ;;  %v1783_v27 = vld [vmem:[#allocation7 + $0xa0] ss:$8 sps:$4 sm:$0xff]   ;;  %v1855_v45 = vld [vmem:[#allocation8 + $0x58] sm:$0xff]  }
  0x7e   :  { %533 = vmatprep.subr.bf16.mxu0 %v1684_v28  ;;  %575 = vmatpush1.bf16.msra.mxu1 %v1731_v49  ;;  %v1788_v28 = vld [vmem:[#allocation7 + $0xb4] ss:$8 sps:$4 sm:$0xff]   ;;  %v1851_v41 = vld [vmem:[#allocation8 + $0x48] sm:$0xff]   ;;  %v175_v49 = vlaneseq }
  0x7f   :  { %576 = vmatprep.subr.bf16.mxu1 %v1732_v50  ;;  %v1852_v42 = vld [vmem:[#allocation8 + $0x8] sm:$0xff]   ;;  %v1856_v46 = vld [vmem:[#allocation8 + $0x18] sm:$0xff]  }
  0x80   :  { %v2163_v50 = vshrl.u32 %v175_v49, 7  ;;  %v1845_v49 = vld [vmem:[#allocation7 + $0x1e4] ss:$8 sps:$4 sm:$0xff]  }
  0x81   :  { %534 = vmatpush1.bf16.msra.mxu0 %v1686_v31  ;;  %v1789_v31 = vld [vmem:[#allocation7 + $0xc0] ss:$8 sps:$4 sm:$0xff]  }
  0x82   :  { %535 = vmatprep.subr.bf16.mxu0 %v1687_v32  ;;  %577 = vmatpush1.bf16.msra.mxu1 %v1734_v53  ;;  %v1794_v32 = vld [vmem:[#allocation7 + $0xd4] ss:$8 sps:$4 sm:$0xff]   ;;  %v181_v53 = vsub.s32 1, %v2163_v50 }
  0x83   :  { %578 = vmatprep.subr.bf16.mxu1 %v1735_v54 }
  0x85   :  { %536 = vmatpush1.bf16.msra.mxu0 %v1689_v35  ;;  %v1795_v35 = vld [vmem:[#allocation7 + $0xe0] ss:$8 sps:$4 sm:$0xff]  }
  0x86   :  { %537 = vmatprep.subr.bf16.mxu0 %v1690_v36  ;;  %579 = vmatpush1.bf16.msra.mxu1 %v1737_v58  ;;  %v1800_v36 = vld [vmem:[#allocation7 + $0xf4] ss:$8 sps:$4 sm:$0xff]  }
  0x87   :  { %580 = vmatprep.subr.bf16.mxu1 %v1738_v60 }
  0x89   :  { %538 = vmatpush1.bf16.msra.mxu0 %v1692_v39  ;;  %v1849_v39 = vld [vmem:[#allocation8 + $0x40] sm:$0xff]  }
  0x8a   :  { %539 = vmatprep.subr.bf16.mxu0 %v1693_v40  ;;  %581 = vmatpush1.bf16.msra.mxu1 %v1740_v63  ;;  %v1850_v40 = vld [vmem:[#allocation8] sm:$0xff]  }
  0x8b   :  { %582 = vmatprep.subr.bf16.mxu1 %v1741_v1 }
  0x8d   :  { %540 = vmatpush1.bf16.msra.mxu0 %v1695_v43  ;;  %v1853_v43 = vld [vmem:[#allocation8 + $0x50] sm:$0xff]  }
  0x8e   :  { %541 = vmatprep.subr.bf16.mxu0 %v1696_v44  ;;  %583 = vmatpush1.bf16.msra.mxu1 %v1743_v3  ;;  %v1854_v44 = vld [vmem:[#allocation8 + $0x10] sm:$0xff]  }
  0x8f   :  { %584 = vmatprep.subr.bf16.mxu1 %v1744_v5  ;;  %v1801_v5 = vld [vmem:[#allocation7 + $0x100] ss:$8 sps:$4 sm:$0xff]  }
  0x91   :  { %542 = vmatpush1.bf16.msra.mxu0 %v1698_v47  ;;  %v1857_v47 = vld [vmem:[#allocation8 + $0x60] sm:$0xff]  }
  0x92   :  { %543 = vmatprep.subr.bf16.mxu0 %v1699_v48  ;;  %585 = vmatpush1.bf16.msra.mxu1 %v1746_v7  ;;  %v1858_v48 = vld [vmem:[#allocation8 + $0x20] sm:$0xff]   ;;  %v1806_v7 = vld [vmem:[#allocation7 + $0x114] ss:$8 sps:$4 sm:$0xff]  }
  0x93   :  { %586 = vmatprep.subr.bf16.mxu1 %v1747_v9  ;;  %v185_v9 = vsub.s32 2, %v2163_v50 }
  0x95   :  { %544 = vmatpush1.bf16.msra.mxu0 %v1701_v51  ;;  %v177_v51 = vsub.s32 0, %v2163_v50 }
  0x96   :  { %545 = vmatprep.subr.bf16.mxu0 %v1705_v52  ;;  %587 = vmatpush1.bf16.msra.mxu1 %v1749_v11  ;;  %v173_v52 = vld [vmem:[%s2206_s2] sm:$0xf]  ;;  %v189_v11 = vsub.s32 3, %v2163_v50  ;;  %v1867_v50 = vld [vmem:[#allocation10 + $0x10] sm:$0xff]  }
  0x97   :  { %588 = vmatprep.subr.bf16.mxu1 %v1750_v13  ;;  %v178_v54 = vrot.slane %v173_v52, %v177_v51  ;;  %v182_v56 = vrot.slane %v173_v52, %v181_v53  ;;  %v186_v13 = vrot.slane %v173_v52, %v185_v9 }
  0x99   :  { %546 = vmatpush1.bf16.msra.mxu0 %v1707_v55 }
  0x9a   :  { %1009 = vmatprep.subr.bf16.mxu0 %v1755_v59  ;;  %589 = vmatpush1.bf16.msra.mxu1 %v1752_v15  ;;  %v190_v15 = vrot.slane %v173_v52, %v189_v11  ;;  %v1843_v52 = vld [vmem:[#allocation7 + $0x1e0] ss:$8 sps:$4 sm:$0xff]  }
  0x9b   :  { %1584 = vmatprep.subr.bf16.mxu1 %v1849_v39  ;;  %v1830_v39 = vld [vmem:[#allocation7 + $0x194] ss:$8 sps:$4 sm:$0xff]  }
  0x9c   :  { %548 = vmatmul.mubr.bf16.vlgmr.msra.gmra.mrb[0].mxu0 %v107_v62 }
  0x9d   :  { %1010 = vmatpush1.bf16.msra.mxu0 %v1753_v61  ;;  %591 = vmatmul.mubr.bf16.vlgmr.msra.gmra.mrb[0].mxu1 %v107_v62 }
  0x9e   :  { %1011 = vmatprep.subr.bf16.mxu0 %v1758_v0  ;;  %1585 = vmatpush3.bf16.msra.mxu1 %v1850_v40  ;;  %v1828_v40 = vld [vmem:[#allocation7 + $0x190] ss:$8 sps:$4 sm:$0xff]  }
  0x9f   :  { %1586 = vmatprep.subr.bf16.mxu1 %v1851_v41  ;;  %v1833_v41 = vld [vmem:[#allocation7 + $0x1a4] ss:$8 sps:$4 sm:$0xff]  }
  0xa1   :  { %1012 = vmatpush1.bf16.msra.mxu0 %v1756_v2 }
  0xa2   :  { %1013 = vmatprep.subr.bf16.mxu0 %v1761_v4  ;;  %1587 = vmatpush3.bf16.msra.mxu1 %v1852_v42  ;;  %v1831_v42 = vld [vmem:[#allocation7 + $0x1a0] ss:$8 sps:$4 sm:$0xff]  }
  0xa3   :  { %1588 = vmatprep.subr.bf16.mxu1 %v1853_v43  ;;  %v1836_v43 = vld [vmem:[#allocation7 + $0x1b4] ss:$8 sps:$4 sm:$0xff]  }
  0xa5   :  { %1014 = vmatpush1.bf16.msra.mxu0 %v1759_v6 }
  0xa6   :  { %1015 = vmatprep.subr.bf16.mxu0 %v1764_v8  ;;  %1589 = vmatpush3.bf16.msra.mxu1 %v1854_v44  ;;  %v1804_v8 = vld [vmem:[#allocation7 + $0x110] ss:$8 sps:$4 sm:$0xff]  }
  0xa7   :  { %1590 = vmatprep.subr.bf16.mxu1 %v1855_v45  ;;  %v1834_v44 = vld [vmem:[#allocation7 + $0x1b0] ss:$8 sps:$4 sm:$0xff]   ;;  %v1839_v45 = vld [vmem:[#allocation7 + $0x1c4] ss:$8 sps:$4 sm:$0xff]  }
  0xa9   :  { %1016 = vmatpush1.bf16.msra.mxu0 %v1762_v10  ;;  %v1809_v10 = vld [vmem:[#allocation7 + $0x124] ss:$8 sps:$4 sm:$0xff]  }
  0xaa   :  { %1017 = vmatprep.subr.bf16.mxu0 %v1767_v12  ;;  %1591 = vmatpush3.bf16.msra.mxu1 %v1856_v46  ;;  %v1807_v12 = vld [vmem:[#allocation7 + $0x120] ss:$8 sps:$4 sm:$0xff]  }
  0xab   :  { %1592 = vmatprep.subr.bf16.mxu1 %v1857_v47  ;;  %v1837_v46 = vld [vmem:[#allocation7 + $0x1c0] ss:$8 sps:$4 sm:$0xff]   ;;  %v1842_v47 = vld [vmem:[#allocation7 + $0x1d4] ss:$8 sps:$4 sm:$0xff]  }
  0xad   :  { %1018 = vmatpush1.bf16.msra.mxu0 %v1765_v14  ;;  %v1812_v14 = vld [vmem:[#allocation7 + $0x134] ss:$8 sps:$4 sm:$0xff]  }
  0xae   :  { %1019 = vmatprep.subr.bf16.mxu0 %v1770_v16  ;;  %1593 = vmatpush3.bf16.msra.mxu1 %v1858_v48  ;;  %v1840_v48 = vld [vmem:[#allocation7 + $0x1d0] ss:$8 sps:$4 sm:$0xff]  }
  0xb1   :  { %1020 = vmatpush1.bf16.msra.mxu0 %v1768_v17  ;;  %v1810_v17 = vld [vmem:[#allocation7 + $0x130] ss:$8 sps:$4 sm:$0xff]  }
  0xb2   :  { %1021 = vmatprep.subr.bf16.mxu0 %v1773_v18 }
  0xb5   :  { %1022 = vmatpush1.bf16.msra.mxu0 %v1771_v19 }
  0xb6   :  { %1023 = vmatprep.subr.bf16.mxu0 %v1776_v20  ;;  %v1815_v20 = vld [vmem:[#allocation7 + $0x144] ss:$8 sps:$4 sm:$0xff]  }
  0xb9   :  { %1024 = vmatpush1.bf16.msra.mxu0 %v1774_v21 }
  0xba   :  { %1025 = vmatprep.subr.bf16.mxu0 %v1779_v22 }
  0xbd   :  { %1026 = vmatpush1.bf16.msra.mxu0 %v1777_v23 }
  0xbe   :  { %1027 = vmatprep.subr.bf16.mxu0 %v1782_v24 }
  0xc1   :  { %1028 = vmatpush1.bf16.msra.mxu0 %v1780_v25 }
  0xc2   :  { %1029 = vmatprep.subr.bf16.mxu0 %v1785_v26  ;;  %v1813_v26 = vld [vmem:[#allocation7 + $0x140] ss:$8 sps:$4 sm:$0xff]  }
  0xc5   :  { %1030 = vmatpush1.bf16.msra.mxu0 %v1783_v27 }
  0xc6   :  { %1031 = vmatprep.subr.bf16.mxu0 %v1788_v28  ;;  %v1818_v28 = vld [vmem:[#allocation7 + $0x154] ss:$8 sps:$4 sm:$0xff]  }
  0xc9   :  { %1032 = vmatpush1.bf16.msra.mxu0 %v1786_v29 }
  0xca   :  { %1033 = vmatprep.subr.bf16.mxu0 %v1791_v30 }
  0xcd   :  { %1034 = vmatpush1.bf16.msra.mxu0 %v1789_v31  ;;  %v1816_v31 = vld [vmem:[#allocation7 + $0x150] ss:$8 sps:$4 sm:$0xff]  }
  0xce   :  { %1035 = vmatprep.subr.bf16.mxu0 %v1794_v32  ;;  %v1821_v32 = vld [vmem:[#allocation7 + $0x164] ss:$8 sps:$4 sm:$0xff]  }
  0xd1   :  { %1036 = vmatpush1.bf16.msra.mxu0 %v1792_v33 }
  0xd2   :  { %1037 = vmatprep.subr.bf16.mxu0 %v1797_v34  ;;  %v1819_v34 = vld [vmem:[#allocation7 + $0x160] ss:$8 sps:$4 sm:$0xff]  }
  0xd5   :  { %1038 = vmatpush1.bf16.msra.mxu0 %v1795_v35  ;;  %v1824_v35 = vld [vmem:[#allocation7 + $0x174] ss:$8 sps:$4 sm:$0xff]  }
  0xd6   :  { %1039 = vmatprep.subr.bf16.mxu0 %v1800_v36  ;;  %v1822_v36 = vld [vmem:[#allocation7 + $0x170] ss:$8 sps:$4 sm:$0xff]  }
  0xd9   :  { %1040 = vmatpush1.bf16.msra.mxu0 %v1798_v37  ;;  %v1827_v37 = vld [vmem:[#allocation7 + $0x184] ss:$8 sps:$4 sm:$0xff]  }
  0xda   :  { %1052 = vmatprep.subr.bf16.mxu0 %v1803_v38  ;;  %v1825_v38 = vld [vmem:[#allocation7 + $0x180] ss:$8 sps:$4 sm:$0xff]  }
 0x16f   :  { %v549_v55 = vpop.f32.mrb[0].mxu0 }
 0x170   :  { %v551_v57 = vpop.f32.mrb[1].mxu0  ;;  %v550_v59 = vadd.f32 %v549_v55, %v178_v54  ;;  %v592_v16 = vpop.f32.mrb[0].mxu1  ;;  %v1846_v55 = vld [vmem:[#allocation7 + $0x1f0] ss:$8 sps:$4 sm:$0xff]  }
 0x171   :  { %v553_v58 = vpop.f32.mrb[2].mxu0  ;;  %v552_v62 = vadd.f32 %v551_v57, %v182_v56  ;;  %v593_v18 = vadd.f32 %v592_v16, %v186_v13  ;;  %v594_v19 = vpop.f32.mrb[1].mxu1 }
 0x172   :  { %v554_v60 = vadd.f32 %v553_v58, %v178_v54  ;;  %v555_v61 = vpop.f32.mrb[3].mxu0  ;;  %v595_v21 = vadd.f32 %v594_v19, %v190_v15  ;;  %v596_v22 = vpop.f32.mrb[2].mxu1  ;;  %v1848_v54 = vld [vmem:[#allocation7 + $0x1f4] ss:$8 sps:$4 sm:$0xff]   ;;  %v1859_v58 = vld [vmem:[#allocation8 + $0x68] sm:$0xff]   ;;  %v1869_v19 = vld [vmem:[#allocation10 + $0x20] sm:$0xff]  }
 0x173   :  { %v556_v63 = vadd.f32 %v555_v61, %v182_v56  ;;  %v597_v23 = vadd.f32 %v596_v22, %v186_v13  ;;  %v598_v24 = vpop.f32.mrb[3].mxu1  ;;  %1594 = vmatprep.subr.bf16.mxu1 %v1859_v58  ;;  %v1862_v61 = vld [vmem:[#allocation8 + $0x30] sm:$0xff]   ;;  %v1872_v22 = vld [vmem:[#allocation10 + $0x38] sm:$0xff]  }
 0x174   :  { %v601_v0 = vpack.c.bf16 %v554_v60, %v550_v59  ;;  %v599_v25 = vadd.f32 %v598_v24, %v190_v15  ;;  %v1860_v59 = vld [vmem:[#allocation8 + $0x28] sm:$0xff]   ;;  %v1861_v60 = vld [vmem:[#allocation8 + $0x70] sm:$0xff]  }
 0x175   :  { %v602_v1 = vpack.c.bf16 %v556_v63, %v552_v62  ;;  %v603_v27 = vpack.c.bf16 %v597_v23, %v593_v18  ;;  %1595 = vmatpush3.bf16.msra.mxu1 %v1860_v59  ;;  %v1863_v62 = vld [vmem:[#allocation8 + $0x78] sm:$0xff]  }
 0x176   :  { %v605_v2 = vmul.bf16 1009007652, %v601_v0  ;;  %v604_v29 = vpack.c.bf16 %v599_v25, %v595_v21  ;;  %1596 = vmatprep.subr.bf16.mxu1 %v1861_v60  ;;  %v1864_v63 = vld [vmem:[#allocation8 + $0x38] sm:$0xff]   ;;  %v1871_v21 = vld [vmem:[#allocation10 + $0x30] sm:$0xff]  }
 0x177   :  { %v606_v3 = vmul.bf16 1009007652, %v602_v1  ;;  %v607_v56 = vmul.bf16 1009007652, %v603_v27 }
 0x178   :  { %v609_v6 = vmax.bf16 %v605_v2, %v601_v0  ;;  %v608_v30 = vmul.bf16 1009007652, %v604_v29  ;;  %v2024_v0 = vmov 0.0  }
 0x179   :  { %v610_v4 = vmax.bf16 %v606_v3, %v602_v1  ;;  %v611_v57 = vmax.bf16 %v607_v56, %v603_v27  ;;  %1597 = vmatpush3.bf16.msra.mxu1 %v1862_v61  ;;  %v677_v1 = vld [vmem:[%s2208_s4] sm:$0x3] }
 0x17a   :  { %v612_v33 = vmax.bf16 %v608_v30, %v604_v29  ;;  %1598 = vmatprep.subr.bf16.mxu1 %v1863_v62  ;;  %v682_v2 = vrot.slane %v677_v1, %v177_v51  ;;  %v1866_v51 = vld [vmem:[#allocation10 + $0x8] sm:$0xff]   ;;  %v1549_v27 = vld [vmem:[%s2210_s6] ss:$0 sm:$0xff]  ;;  %s1983_s6 = scalar_lea.vmem %s1408_s20, 128 }
 0x17b   :  { %1041 = vmatprep.mubr.bf16.mxu0 %v610_v4  ;;  %v686_v4 = vrot.slane %v677_v1, %v181_v53  ;;  %v1868_v53 = vld [vmem:[#allocation10 + $0x18] sm:$0xff]   ;;  %p1984_p12 = scmp.ne.s32.totalorder %s1408_s20, %s1983_s6  ;;  %p1989_p0 = scmp.lt.s32.totalorder %s1983_s6, %s1983_s6 }
 0x17c   :  { %1042 = vmatmul.mubr.bf16.vlgmr.msra.gmra.mrb[4].mxu0 %v609_v6 }
 0x17d   :  { %1053 = vmatpush1.bf16.msra.mxu0 %v1801_v5  ;;  %1084 = vmatprep.mubr.bf16.mxu0 %v612_v33  ;;  %p1990_p1 = por %p1989_p0, %p1988_p13 }
 0x17e   :  { %1054 = vmatprep.subr.bf16.mxu0 %v1806_v7  ;;  %1599 = vmatpush3.bf16.msra.mxu1 %v1864_v63 }
 0x17f   :  { %1615 = vmatprep.subr.bf16.mxu1 %v2024_v0  ;;  %p1991_p2 = pnand %p1990_p1, %p1984_p12 }
 0x181   :  { %1055 = vmatpush1.bf16.msra.mxu0 %v1804_v8 }
 0x182   :  { %1056 = vmatprep.subr.bf16.mxu0 %v1809_v10 }
 0x185   :  { %1057 = vmatpush1.bf16.msra.mxu0 %v1807_v12 }
 0x186   :  { %1058 = vmatprep.subr.bf16.mxu0 %v1812_v14 }
 0x189   :  { %1059 = vmatpush1.bf16.msra.mxu0 %v1810_v17  ;;  %v1865_v17 = vld [vmem:[#allocation10] sm:$0xff]  }
 0x18a   :  { %1060 = vmatprep.subr.bf16.mxu0 %v1815_v20  ;;  %v1870_v20 = vld [vmem:[#allocation10 + $0x28] sm:$0xff]  }
 0x18d   :  { %1061 = vmatpush1.bf16.msra.mxu0 %v1813_v26 }
 0x18e   :  { %1062 = vmatprep.subr.bf16.mxu0 %v1818_v28 }
 0x191   :  { %1063 = vmatpush1.bf16.msra.mxu0 %v1816_v31 }
 0x192   :  { %1064 = vmatprep.subr.bf16.mxu0 %v1821_v32 }
 0x195   :  { %1065 = vmatpush1.bf16.msra.mxu0 %v1819_v34 }
 0x196   :  { %1066 = vmatprep.subr.bf16.mxu0 %v1824_v35  ;;  %v1566_v35 = vld [vmem:[%s2212_s8] ss:$0 sm:$0xff] }
 0x199   :  { %1067 = vmatpush1.bf16.msra.mxu0 %v1822_v36 }
 0x19a   :  { %1068 = vmatprep.subr.bf16.mxu0 %v1827_v37 }
 0x19d   :  { %1069 = vmatpush1.bf16.msra.mxu0 %v1825_v38 }
 0x19e   :  { %1070 = vmatprep.subr.bf16.mxu0 %v1830_v39 }
 0x1a1   :  { %1071 = vmatpush1.bf16.msra.mxu0 %v1828_v40 }
 0x1a2   :  { %1072 = vmatprep.subr.bf16.mxu0 %v1833_v41 }
 0x1a5   :  { %1073 = vmatpush1.bf16.msra.mxu0 %v1831_v42 }
 0x1a6   :  { %1074 = vmatprep.subr.bf16.mxu0 %v1836_v43 }
 0x1a9   :  { %1075 = vmatpush1.bf16.msra.mxu0 %v1834_v44 }
 0x1aa   :  { %1076 = vmatprep.subr.bf16.mxu0 %v1839_v45 }
 0x1ad   :  { %1077 = vmatpush1.bf16.msra.mxu0 %v1837_v46 }
 0x1ae   :  { %1078 = vmatprep.subr.bf16.mxu0 %v1842_v47 }
 0x1b1   :  { %1079 = vmatpush1.bf16.msra.mxu0 %v1840_v48 }
 0x1b2   :  { %1080 = vmatprep.subr.bf16.mxu0 %v1845_v49 }
 0x1b5   :  { %1081 = vmatpush1.bf16.msra.mxu0 %v1843_v52 }
 0x1b6   :  { %1082 = vmatprep.subr.bf16.mxu0 %v1848_v54 }
 0x1b9   :  { %1083 = vmatpush1.bf16.msra.mxu0 %v1846_v55 }
 0x1bc   :  { %1085 = vmatmul.mubr.bf16.vlgmr.msra.gmra.mrb[4].mxu0 %v611_v57 }
 0x28f   :  { %v1086_v3 = vpop.f32.mrb[4].mxu0 }
 0x290   :  { %v1088_v5 = vpop.f32.mrb[5].mxu0  ;;  %v1635_v7 = vadd.f32 %v1086_v3, %v682_v2 }
 0x291   :  { %v1090_v6 = vpop.f32.mrb[6].mxu0  ;;  %v1636_v10 = vadd.f32 %v1088_v5, %v686_v4 }
 0x292   :  { %v1637_v8 = vadd.f32 %v1090_v6, %v682_v2  ;;  %v1092_v9 = vpop.f32.mrb[7].mxu0 }
 0x293   :  { %v1638_v11 = vadd.f32 %v1092_v9, %v686_v4 }
 0x294   :  { %v1095_v12 = vpack.c.bf16 %v1637_v8, %v1635_v7 }
 0x295   :  { %v1096_v13 = vpack.c.bf16 %v1638_v11, %v1636_v10 }
 0x296   :  { %v1097_v14 = vmul.bf16 1009007652, %v1095_v12 }
 0x297   :  { %v1098_v15 = vmul.bf16 1009007652, %v1096_v13 }
 0x298   :  { %v1099_v18 = vmax.bf16 %v1097_v14, %v1095_v12 }
 0x299   :  { %v1100_v16 = vmax.bf16 %v1098_v15, %v1096_v13 }
 0x29b   :  { %1268 = vmatprep.mubr.bf16.mxu1 %v1100_v16 }
 0x29c   :  { %1269 = vmatmul.mubr.bf16.vlgmr.msra.gmra.mrb[4].mxu1 %v1099_v18 }
 0x29d   :  { %1616 = vmatpush3.bf16.msra.mxu1 %v1865_v17  ;;  %1631 = vmatprep.mubr.msk.bf16.mxu1 %vm2025_vm0, %v2024_v0 }
 0x29e   :  { %1617 = vmatprep.subr.bf16.mxu1 %v2024_v0 }
 0x2a1   :  { %1618 = vmatpush3.bf16.msra.mxu1 %v1866_v51 }
 0x2a2   :  { %1619 = vmatprep.subr.bf16.mxu1 %v2024_v0 }
 0x2a5   :  { %1620 = vmatpush3.bf16.msra.mxu1 %v1867_v50 }
 0x2a6   :  { %1621 = vmatprep.subr.bf16.mxu1 %v2024_v0 }
 0x2a9   :  { %1622 = vmatpush3.bf16.msra.mxu1 %v1868_v53 }
 0x2aa   :  { %1623 = vmatprep.subr.bf16.mxu1 %v2024_v0 }
 0x2ad   :  { %1624 = vmatpush3.bf16.msra.mxu1 %v1869_v19 }
 0x2ae   :  { %1625 = vmatprep.subr.bf16.mxu1 %v2024_v0 }
 0x2b1   :  { %1626 = vmatpush3.bf16.msra.mxu1 %v1870_v20 }
 0x2b2   :  { %1627 = vmatprep.subr.bf16.mxu1 %v2024_v0 }
 0x2b5   :  { %1628 = vmatpush3.bf16.msra.mxu1 %v1871_v21 }
 0x2b6   :  { %1629 = vmatprep.subr.bf16.mxu1 %v2024_v0 }
 0x2b9   :  { %1630 = vmatpush3.bf16.msra.mxu1 %v1872_v22 }
 0x36f   :  { %v1600_v23 = vpop.f32.mrb[4].mxu1 }
 0x370   :  { %v1601_v24 = vpop.f32.mrb[5].mxu1 }
 0x371   :  { %v1602_v25 = vadd.f32 %v1601_v24, %v1600_v23  ;;  %v1603_v26 = vpop.f32.mrb[6].mxu1 }
 0x372   :  { %v1604_v28 = vpop.f32.mrb[7].mxu1 }
 0x373   :  { %v1605_v29 = vadd.f32 %v1604_v28, %v1603_v26  ;;  %v1271_v30 = vadd.f32 %v1602_v25, %v1549_v27 }
 0x375   :  { %v1274_v31 = vadd.f32 %v1605_v29, %v1549_v27 }
 0x377   :  { %v1277_v32 = vpack.c.bf16 %v1274_v31, %v1271_v30 }
 0x379   :  { %v1278_v33 = vmul.bf16 1009007652, %v1277_v32 }
 0x37b   :  { %v1279_v34 = vmax.bf16 %v1278_v33, %v1277_v32 }
 0x37d   :  { %1632 = vmatmul.mubr.bf16.vlgmr.msra.gmra.mrb[8].mxu1 %v1279_v34 }
 0x450   :  { %v1385_v36 = vpop.f32.mrb[8].mxu1 }
 0x451   :  { %v1633_v37 = vpop.f32.mrb[9].mxu1  ;;  %v1386_v39 = vadd.f32 %v1566_v35, %v1385_v36 }
 0x452   :  { %v1388_v38 = vpop.f32.mrb[10].mxu1 }
 0x453   :  { %v1389_v40 = vadd.f32 %v1566_v35, %v1388_v38  ;;  %v1634_v41 = vpop.f32.mrb[11].mxu1 }
 0x455   :  { %v1582_v42 = vpack.c.bf16 %v1389_v40, %v1386_v39 }
 0x457   :  { %1583 = vst [vmem:[#allocation11] sm:$0xff] %v1582_v42  }
 0x458   :  { %1994 = shalt.err (!%p1991_p2)
}
 0x459   :  { %s1995_s21 = scalar_lea.hbm %s2213_s9, 128 }
 0x45a   :  { %p1996_p3 = scmp.ne.s32.totalorder %s2213_s9, %s1995_s21  ;;  %p1999_p4 = scmp.lt.u32.totalorder %s1995_s21, %s2213_s9 }
 0x45c   :  { %p2001_p5 = pnand %p1999_p4, %p1996_p3 }
 0x45e   :  { %2004 = shalt.err (!%p2001_p5)
}
 0x45f   :  { %1413 = dma.vmem_to_hbm [thread:$0]  %s1408_s20, 128, %s2213_s9, [#allocation4], %s2017_s1, %s2017_s1, %s2018_s10  }
 0x460   :  { %2011 = dma.done.wait [#allocation4], 128  }
 0x461   :  { %2012 = vsyncadd [#allocation4], 4294967168 }
 0x462   :  { %1417 = vsyncpa [#allocation3], 1 }
 0x463   :  { %1418 = vsyncpa [#allocation6], 1 }
 0x464   :  { %1419 = vsyncpa [#allocation9], 1 }
 0x465   :  { %1420 = vsyncpa [#allocation4], 1 }

</bundles_post_ra>
